<compile_context>
chip_gen: v6e
topology: v6e:2x2x1
jax: 0.10.0
libtpu: 0.0.40
codegen_flags: <defaults>
</compile_context>

<pallas_src>
import functools

import jax
import jax.numpy as jnp
from jax import lax
from jax.experimental import pallas as pl
from jax.experimental.pallas import tpu as pltpu


def _conv_pool_kernel(xcol_ref, w_ref, b_ref, pooled_ref, stats_ref, *,
                      window, kc, l_pool):
    """Per-batch tile: fused conv (both branches) + max-pool + BN partial stats.

    xcol_ref   : (1, l_rows, window*kc)  im2col, pooling phases folded into lanes
    w_ref      : (kc, 2*Cout)            both branches' weights, side by side
    b_ref      : (1, 2*Cout)             both branches' biases
    pooled_ref : (1, l_rows, 2*Cout)     pre-BN pooled activations (f32)
    stats_ref  : (1, 2, 2*Cout)          per-batch [sum ; sum of squares]
    """
    xc = xcol_ref[0]                                   # (l_rows, window*kc)
    w = w_ref[...]                                     # (kc, 2*Cout)

    # One MXU dot per pooling phase (contraction = K*Cin, output = 2*Cout);
    # the pooling itself is a pure-VPU elementwise max — no selection matmuls.
    pooled = jnp.dot(xc[:, 0:kc], w, preferred_element_type=jnp.float32)
    for p in range(1, window):
        pooled = jnp.maximum(
            pooled,
            jnp.dot(xc[:, p * kc:(p + 1) * kc], w,
                    preferred_element_type=jnp.float32))
    pooled = pooled + b_ref[...]                       # bias commutes with max
    pooled_ref[0] = pooled.astype(pooled_ref.dtype)

    # BatchNorm partial statistics (single pass: sum and sum of squares),
    # excluding the sublane-alignment pad rows.
    l_rows = pooled.shape[0]
    if l_rows != l_pool:
        mask = lax.broadcasted_iota(jnp.int32, (l_rows, 1), 0) < l_pool
        pooled = jnp.where(mask, pooled, 0.0)
    s = jnp.sum(pooled, axis=0, keepdims=True)
    ss = jnp.sum(pooled * pooled, axis=0, keepdims=True)
    stats_ref[0] = jnp.concatenate([s, ss], axis=0)


def _gate_kernel(pooled_ref, ss_ref, o_ref, *, c_out, activation):
    """Per-batch tile: BatchNorm affine + sigmoid gate * (optional activation)."""
    p = pooled_ref[0]                                  # (l_rows, 2*Cout) f32
    y = p * ss_ref[0:1, :] + ss_ref[1:2, :]            # fused BN scale/shift
    gate = jax.nn.sigmoid(y[:, :c_out])                # branch 1 -> gate (EUP)
    lin = y[:, c_out:]                                 # branch 2
    if activation is not None:
        lin = activation(lin)
    o_ref[0] = (gate * lin).astype(o_ref.dtype)


def gating_block_forward(x, params, *, stride=1, padding=0, pooling=True,
                         eps=1e-5, activation=None):
    """x: (N, C_in, L) in PyTorch Conv1d layout. Returns (N, C_out, L_final)."""
    w1, b1, g1, be1, w2, b2, g2, be2 = params
    n, c_in, l = x.shape
    c_out, _, k = w1.shape
    if padding:
        x = jnp.pad(x, ((0, 0), (0, 0), (padding, padding)))
    l_pad = l + 2 * padding
    l_conv = (l_pad - k) // stride + 1
    window = 3 if pooling else 1
    l_pool = l_conv // window
    l_rows = -(-l_pool // 8) * 8            # sublane-aligned rows per tile
    kc = k * c_in

    # ---- wrapper-side layout plumbing: channels-last + im2col ---------------
    # xcol[b, j, p*kc + t*Cin + c] = x[b, c, (j*window + p)*stride + t]
    # (pooling phase p and conv tap t folded into the lane dimension so the
    #  kernel only does dense matmuls + elementwise max).
    x_cl = jnp.transpose(x, (0, 2, 1)).astype(jnp.float32)        # (N, l_pad, Cin)
    pos = ((jnp.arange(l_pool)[:, None, None] * window
            + jnp.arange(window)[None, :, None]) * stride
           + jnp.arange(k)[None, None, :])                        # (l_pool, window, K)
    xcol = x_cl[:, pos, :].reshape(n, l_pool, window * kc)
    if l_rows != l_pool:
        xcol = jnp.pad(xcol, ((0, 0), (0, l_rows - l_pool), (0, 0)))

    def _w(wc):   # (Cout, Cin, K) -> (K*Cin, Cout), row index = t*Cin + c
        return jnp.transpose(wc, (2, 1, 0)).reshape(kc, c_out).astype(jnp.float32)

    wcat = jnp.concatenate([_w(w1), _w(w2)], axis=1)              # (kc, 2*Cout)
    bcat = jnp.concatenate([b1, b2]).reshape(1, 2 * c_out).astype(jnp.float32)

    # ---- pass 1: conv + pool + BN partial stats (one grid step per batch) ---
    pooled, stats = pl.pallas_call(
        functools.partial(_conv_pool_kernel, window=window, kc=kc,
                          l_pool=l_pool),
        grid=(n,),
        in_specs=[
            pl.BlockSpec((1, l_rows, window * kc), lambda i: (i, 0, 0)),
            pl.BlockSpec((kc, 2 * c_out), lambda i: (0, 0)),
            pl.BlockSpec((1, 2 * c_out), lambda i: (0, 0)),
        ],
        out_specs=[
            pl.BlockSpec((1, l_rows, 2 * c_out), lambda i: (i, 0, 0)),
            pl.BlockSpec((1, 2, 2 * c_out), lambda i: (i, 0, 0)),
        ],
        out_shape=[
            jax.ShapeDtypeStruct((n, l_rows, 2 * c_out), jnp.float32),
            jax.ShapeDtypeStruct((n, 2, 2 * c_out), jnp.float32),
        ],
        compiler_params=pltpu.CompilerParams(
            dimension_semantics=("parallel",)),
    )(xcol, wcat, bcat)

    # ---- tiny cross-tile BN finalize (training-mode stats, biased variance) -
    count = n * l_pool
    mean = jnp.sum(stats[:, 0, :], axis=0) / count
    var = jnp.maximum(jnp.sum(stats[:, 1, :], axis=0) / count - mean * mean, 0.0)
    gcat = jnp.concatenate([g1, g2]).astype(jnp.float32)
    becat = jnp.concatenate([be1, be2]).astype(jnp.float32)
    scale = gcat * lax.rsqrt(var + eps)
    shift = becat - mean * scale
    scale_shift = jnp.stack([scale, shift], axis=0)               # (2, 2*Cout)

    # ---- pass 2: normalize + sigmoid gate (+ activation) + multiply ---------
    out = pl.pallas_call(
        functools.partial(_gate_kernel, c_out=c_out, activation=activation),
        grid=(n,),
        in_specs=[
            pl.BlockSpec((1, l_rows, 2 * c_out), lambda i: (i, 0, 0)),
            pl.BlockSpec((2, 2 * c_out), lambda i: (0, 0)),
        ],
        out_specs=pl.BlockSpec((1, l_rows, c_out), lambda i: (i, 0, 0)),
        out_shape=jax.ShapeDtypeStruct((n, l_rows, c_out), x.dtype),
        compiler_params=pltpu.CompilerParams(
            dimension_semantics=("parallel",)),
    )(pooled, scale_shift)

    # back to PyTorch NCL layout, dropping alignment pad rows
    return jnp.transpose(out[:, :l_pool, :], (0, 2, 1))


def _reference(x, params, *, stride, padding, pooling, eps, activation=None):
    """Pure-JAX (XLA) reference mirroring the PyTorch forward."""
    w1, b1, g1, be1, w2, b2, g2, be2 = params

    def conv1d(xx, w, b):
        y = lax.conv_general_dilated(xx, w, (stride,), [(padding, padding)],
                                     dimension_numbers=("NCH", "OIH", "NCH"))
        return y + b[None, :, None]

    def maxpool3(y):
        nn, cc, ll = y.shape
        lp = ll // 3
        return jnp.max(y[:, :, :lp * 3].reshape(nn, cc, lp, 3), axis=-1)

    def bn(y, g, be):
        m = jnp.mean(y, axis=(0, 2), keepdims=True)
        v = jnp.mean((y - m) ** 2, axis=(0, 2), keepdims=True)
        return (y - m) * lax.rsqrt(v + eps) * g[None, :, None] + be[None, :, None]

    o1 = conv1d(x, w1, b1)
    if pooling:
        o1 = maxpool3(o1)
    o1 = jax.nn.sigmoid(bn(o1, g1, be1))
    o2 = conv1d(x, w2, b2)
    if pooling:
        o2 = maxpool3(o2)
    o2 = bn(o2, g2, be2)
    if activation is not None:
        o2 = activation(o2)
    return o1 * o2


if __name__ == "__main__":
    # Shapes consistent with GatingBlock(in_channels=4, out_channels=8,
    # kernel_size=3): x is (N, C_in, L) = (2, 4, 50).
    n, c_in, c_out, l, k = 2, 4, 8, 50, 3

    key = jax.random.PRNGKey(0)
    k_w1, k_b1, k_w2, k_b2 = jax.random.split(key, 4)
    fan_in = c_in * k
    w_bound = (6.0 / fan_in) ** 0.5          # kaiming_uniform_ bound
    b_bound = 1.0 / fan_in ** 0.5            # PyTorch Conv1d default bias bound
    w1 = jax.random.uniform(k_w1, (c_out, c_in, k), jnp.float32, -w_bound, w_bound)
    b1 = jax.random.uniform(k_b1, (c_out,), jnp.float32, -b_bound, b_bound)
    w2 = jax.random.uniform(k_w2, (c_out, c_in, k), jnp.float32, -w_bound, w_bound)
    b2 = jax.random.uniform(k_b2, (c_out,), jnp.float32, -b_bound, b_bound)
    g1 = jnp.ones((c_out,), jnp.float32)
    be1 = jnp.zeros((c_out,), jnp.float32)
    g2 = jnp.ones((c_out,), jnp.float32)
    be2 = jnp.zeros((c_out,), jnp.float32)
    params = (w1, b1, g1, be1, w2, b2, g2, be2)

    x = jax.random.normal(jax.random.PRNGKey(1), (n, c_in, l), jnp.float32)
    out = gating_block_forward(x, params, stride=1, padding=0, pooling=True)
    out = jax.block_until_ready(out)
    ref = _reference(x, params, stride=1, padding=0, pooling=True, eps=1e-5)
    assert out.shape == ref.shape, (out.shape, ref.shape)
    err = float(jnp.max(jnp.abs(out - ref)))
    assert jnp.allclose(out, ref, atol=1e-4, rtol=1e-3), err

    # Second config: conv padding + a pooled length that is NOT a multiple of 8
    # (exercises the sublane-alignment pad rows and BN stat masking path).
    x2 = jax.random.normal(jax.random.PRNGKey(2), (n, c_in, 40), jnp.float32)
    out2 = jax.block_until_ready(
        gating_block_forward(x2, params, stride=1, padding=1, pooling=True))
    ref2 = _reference(x2, params, stride=1, padding=1, pooling=True, eps=1e-5)
    assert out2.shape == ref2.shape, (out2.shape, ref2.shape)
    err2 = float(jnp.max(jnp.abs(out2 - ref2)))
    assert jnp.allclose(out2, ref2, atol=1e-4, rtol=1e-3), err2

    print("KERNEL_OK")
</pallas_src>

<mosaic_0001>
module attributes {stable_mosaic.version = 11 : i64} {
  func.func @_conv_pool_kernel(%arg0: i32, %arg1: memref<1x16x36xf32, #tpu.memory_space<vmem>>, %arg2: memref<12x16xf32, #tpu.memory_space<vmem>>, %arg3: memref<1x16xf32, #tpu.memory_space<vmem>>, %arg4: memref<1x16x16xf32, #tpu.memory_space<vmem>>, %arg5: memref<1x2x16xf32, #tpu.memory_space<vmem>>) attributes {dimension_semantics = [#tpu.dimension_semantics<parallel>], iteration_bounds = array<i64: 2>, scalar_prefetch = 0 : i64, scratch_operands = 0 : i64, tpu.core_type = #tpu.core_type<tc>, window_params = [{transform_indices = @transform_0, window_bounds = array<i64: 1, 16, 36>}, {pipeline_mode = #tpu.pipeline_mode<synchronous>, transform_indices = @transform_1, window_bounds = array<i64: 12, 16>}, {pipeline_mode = #tpu.pipeline_mode<synchronous>, transform_indices = @transform_2, window_bounds = array<i64: 1, 16>}, {transform_indices = @transform_3, window_bounds = array<i64: 1, 16, 16>}, {transform_indices = @transform_4, window_bounds = array<i64: 1, 2, 16>}]} {
    %c0 = arith.constant 0 : index
    %c0_0 = arith.constant 0 : index
    %c0_1 = arith.constant 0 : index
    %0 = vector.load %arg1[%c0, %c0_0, %c0_1] : memref<1x16x36xf32, #tpu.memory_space<vmem>>, vector<1x16x36xf32>
    %1 = vector.shape_cast %0 : vector<1x16x36xf32> to vector<16x36xf32>
    %c0_2 = arith.constant 0 : index
    %c0_3 = arith.constant 0 : index
    %2 = vector.load %arg2[%c0_2, %c0_3] : memref<12x16xf32, #tpu.memory_space<vmem>>, vector<12x16xf32>
    %3 = vector.extract_strided_slice %1 {offsets = [0, 0], sizes = [16, 12], strides = [1, 1]} : vector<16x36xf32> to vector<16x12xf32>
    %cst = arith.constant dense<0.000000e+00> : vector<16x16xf32>
    %4 = tpu.matmul %3, %2, %cst {dimension_numbers = #tpu.dot_dimension_numbers<[1], [0], [0], [1], [0, 0, 1, 1], [], []>} : vector<16x12xf32>, vector<12x16xf32>, vector<16x16xf32> -> vector<16x16xf32>
    %5 = vector.extract_strided_slice %1 {offsets = [0, 12], sizes = [16, 12], strides = [1, 1]} : vector<16x36xf32> to vector<16x12xf32>
    %cst_4 = arith.constant dense<0.000000e+00> : vector<16x16xf32>
    %6 = tpu.matmul %5, %2, %cst_4 {dimension_numbers = #tpu.dot_dimension_numbers<[1], [0], [0], [1], [0, 0, 1, 1], [], []>} : vector<16x12xf32>, vector<12x16xf32>, vector<16x16xf32> -> vector<16x16xf32>
    %7 = arith.maximumf %4, %6 : vector<16x16xf32>
    %8 = vector.extract_strided_slice %1 {offsets = [0, 24], sizes = [16, 12], strides = [1, 1]} : vector<16x36xf32> to vector<16x12xf32>
    %cst_5 = arith.constant dense<0.000000e+00> : vector<16x16xf32>
    %9 = tpu.matmul %8, %2, %cst_5 {dimension_numbers = #tpu.dot_dimension_numbers<[1], [0], [0], [1], [0, 0, 1, 1], [], []>} : vector<16x12xf32>, vector<12x16xf32>, vector<16x16xf32> -> vector<16x16xf32>
    %10 = arith.maximumf %7, %9 : vector<16x16xf32>
    %c0_6 = arith.constant 0 : index
    %c0_7 = arith.constant 0 : index
    %11 = vector.load %arg3[%c0_6, %c0_7] : memref<1x16xf32, #tpu.memory_space<vmem>>, vector<1x16xf32>
    %12 = vector.broadcast %11 : vector<1x16xf32> to vector<16x16xf32>
    %13 = arith.addf %10, %12 : vector<16x16xf32>
    %c0_8 = arith.constant 0 : index
    %c0_9 = arith.constant 0 : index
    %c0_10 = arith.constant 0 : index
    %14 = vector.load %arg4[%c0_8, %c0_9, %c0_10] : memref<1x16x16xf32, #tpu.memory_space<vmem>>, vector<1x16x16xf32>
    %15 = vector.shape_cast %14 : vector<1x16x16xf32> to vector<16x16xf32>
    %16 = vector.shape_cast %13 : vector<16x16xf32> to vector<1x16x16xf32>
    tpu.vector_store %arg4[%c0_8, %c0_9, %c0_10], %16 {strides = array<i32>} : memref<1x16x16xf32, #tpu.memory_space<vmem>>, vector<1x16x16xf32>,
    %cst_11 = arith.constant dense<0.000000e+00> : vector<16xf32>
    %17 = vector.multi_reduction <add>, %13, %cst_11 [0] : vector<16x16xf32> to vector<16xf32>
    %18 = vector.shape_cast %17 : vector<16xf32> to vector<1x16xf32>
    %19 = arith.mulf %13, %13 : vector<16x16xf32>
    %cst_12 = arith.constant dense<0.000000e+00> : vector<16xf32>
    %20 = vector.multi_reduction <add>, %19, %cst_12 [0] : vector<16x16xf32> to vector<16xf32>
    %21 = vector.shape_cast %20 : vector<16xf32> to vector<1x16xf32>
    %22 = tpu.concatenate %18, %21 in 0 : vector<1x16xf32>, vector<1x16xf32> -> vector<2x16xf32>
    %c0_13 = arith.constant 0 : index
    %c0_14 = arith.constant 0 : index
    %c0_15 = arith.constant 0 : index
    %23 = vector.load %arg5[%c0_13, %c0_14, %c0_15] : memref<1x2x16xf32, #tpu.memory_space<vmem>>, vector<1x2x16xf32>
    %24 = vector.shape_cast %23 : vector<1x2x16xf32> to vector<2x16xf32>
    %25 = vector.shape_cast %22 : vector<2x16xf32> to vector<1x2x16xf32>
    tpu.vector_store %arg5[%c0_13, %c0_14, %c0_15], %25 {strides = array<i32>} : memref<1x2x16xf32, #tpu.memory_space<vmem>>, vector<1x2x16xf32>,
    return
  }
  func.func @transform_0(%arg0: i32) -> (i32, i32, i32) {
    %c0_i32 = arith.constant 0 : i32
    %c0_i32_0 = arith.constant 0 : i32
    %c0_i32_1 = arith.constant 0 : i32
    return %arg0, %c0_i32, %c0_i32_0 : i32, i32, i32
  }
  func.func @transform_1(%arg0: i32) -> (i32, i32) {
    %c0_i32 = arith.constant 0 : i32
    %c0_i32_0 = arith.constant 0 : i32
    %c0_i32_1 = arith.constant 0 : i32
    return %c0_i32, %c0_i32_0 : i32, i32
  }
  func.func @transform_2(%arg0: i32) -> (i32, i32) {
    %c0_i32 = arith.constant 0 : i32
    %c0_i32_0 = arith.constant 0 : i32
    %c0_i32_1 = arith.constant 0 : i32
    return %c0_i32, %c0_i32_0 : i32, i32
  }
  func.func @transform_3(%arg0: i32) -> (i32, i32, i32) {
    %c0_i32 = arith.constant 0 : i32
    %c0_i32_0 = arith.constant 0 : i32
    %c0_i32_1 = arith.constant 0 : i32
    return %arg0, %c0_i32, %c0_i32_0 : i32, i32, i32
  }
  func.func @transform_4(%arg0: i32) -> (i32, i32, i32) {
    %c0_i32 = arith.constant 0 : i32
    %c0_i32_0 = arith.constant 0 : i32
    %c0_i32_1 = arith.constant 0 : i32
    return %arg0, %c0_i32, %c0_i32_0 : i32, i32, i32
  }
}

</mosaic_0001>

<bundles_post_ra>
// kernel: tpu_custom_call.1
= control target key start
LH: loop header
LB: loop body
LE: loop exit
PB: predicated region body
PF: predicated region fallthrough
CT: control target
= control target key end

     0   :  { %10 = vsyncpa [#allocation3], 0  ;;  %s1238_s0 = inlined_call_operand.hbm [shape: f32[2,16,36], index: 0, kind: input, shape index: {}]   ;;  %s1239_s1 = inlined_call_operand.hbm [shape: f32[12,16], index: 1, kind: input, shape index: {}]   ;;  %s1240_s2 = inlined_call_operand.vmem [shape: f32[1,16], index: 2, kind: input, shape index: {}]   ;;  %s1241_s3 = inlined_call_operand.hbm [shape: f32[2,16,16], index: 3, kind: output, shape index: {0}]   ;;  %s1242_s4 = inlined_call_operand.hbm [shape: f32[2,2,16], index: 4, kind: output, shape index: {1}]  }
   0x1   :  { %12 = vsyncpa [#allocation3 + $0x1], 0 }
   0x2   :  { %13 = vsyncpa [#allocation6], 0 }
   0x3   :  { %14 = vsyncpa [#allocation4], 0 }
   0x4   :  { %16 = vsyncpa [#allocation4 + $0x1], 0 }
   0x5   :  { %17 = vsyncpa [#allocation9], 0 }
   0x6   :  { %19 = vsyncpa [#allocation9 + $0x1], 0  ;;  %s1006_s15 = smov 0   ;;  %s1008_s16 = smov 0  }
   0x7   :  { %s1010_s17 = smov 0   ;;  %s1012_s18 = smov 0  }
   0x8 LB: > { %s1027_s19 = sadd.s32 4294967295, %s969_s18   ;;  %s685_s20 = sadd.s32 4294967294, %s969_s18   ;;  %s969_s18 = sphi %s1012_s18, %s1264_s18   ;;  %s965_s17 = sphi %s1010_s17, %s1263_s17   ;;  %s961_s16 = sphi %s1008_s16, %s1262_s16   ;;  %s957_s15 = sphi %s1006_s15, %s1261_s15  }
   0x9   : > { %p45_p0 = scmp.ne.s32.totalorder %s961_s16, %s957_s15  ;;  %p1243_p1 = scmp.eq.s32.totalorder %s1027_s19, 0 }
   0xa   : > { %p117_p3 = scmp.eq.s32.totalorder %s685_s20, 1  ;;  %p686_p5 = scmp.ge.s32.totalorder %s969_s18, 1 }
   0xb   : > { %p1036_p4 = por %p1243_p1, %p45_p0  ;;  %p150_p7 = scmp.lt.s32.totalorder %s969_s18, 3 }
   0xc   : > { %p1041_p6 = por %p117_p3, %p45_p0  ;;  %s971_s24 = smov [#allocation5]  }
   0xd   : > { %s1247_s21 = scalar_select %p1036_p4, 1, 0 }
   0xe   : > { %s1248_s22 = scalar_select %p1041_p6, 1, 0 }
   0xf   : > { %p1046_p8 = pnand %p686_p5, %p150_p7  ;;  %s162_s25 = sshll.u32 %s971_s24, 4  ;;  %s163_s25 = int_to_ptr.vmem [resolvable:$true] %s162_s25 }
  0x10   : > { %s1060_s27 = sadd.s32 1, %s969_s18   ;;  %s32_s28 = sadd.s32 1, %s965_s17 }
  0x11   : > { %s1249_s23 = scalar_select %p1046_p8, 1, 0 }
  0x12   : > { %p759_p9 = pneg %p1046_p8  ;;  %s29_s29 = ssub.s32 %s969_s18, %s1060_s27 }
  0x13   : > { %s828_s30 = scalar_lea.vmem %s163_s25, 256  ;;  %p836_p5 = scmp.lt.s32.totalorder %s163_s25, %s163_s25 }
  0x14   : > { %p1055_p11 = pnand %p759_p9, %p1243_p1  ;;  %p829_p13 = scmp.ne.s32.totalorder %s163_s25, %s828_s30 }
  0x15   : > { %p837_p7 = scmp.lt.s32.totalorder %s828_s30, %s828_s30 }
  0x16   : > { %p819_p12 = pneg %p1055_p11 }
  0x17   : > { %p838_p10 = por %p837_p7, %p836_p5 }
  0x18   : > { %p831_p0 = pnand %p829_p13, %p819_p12 }
  0x1a   : > { %p832_p3 = pneg %p831_p0 }
  0x1c   : > { %p839_p2 = pnand %p838_p10, %p832_p3 }
  0x1e   : > { %842 = shalt.err (!%p839_p2)
}
  0x1f   : > { %s972_s5 = smov 128   ;;  %s973_s6 = smov 8  }
  0x20   : > { %762 = dma.hbm_to_vmem [thread:$0]  (!%p1055_p11), %s1239_s1, 256, %s163_s25, [#allocation6], %s972_s5, %s972_s5, %s973_s6  }
  0x21   : > { %p30_p2 = scmp.eq.s32.totalorder %s29_s29, 0  ;;  %p39_p9 = scmp.ne.s32.totalorder %s965_s17, %s961_s16 }
  0x22   : > { %p40_p10 = scmp.eq.s32.totalorder %s969_s18, 0  ;;  %p775_p12 = scmp.lt.s32.totalorder %s969_s18, 2 }
  0x23   : > { %s1080_s9 = scalar_select %p30_p2, %s965_s17, %s32_s28  }
  0x24   : > { %p41_p13 = por %p40_p10, %p39_p9  ;;  %p1251_p0 = scmp.eq.s32.totalorder %s1027_s19, 1 }
  0x25   : > { %s179_s11 = sand.u32 1, %s965_s17   ;;  %s714_s12 = sshll.u32 %s969_s18, 8 }
  0x26   : > { %p1084_p3 = por %p1251_p0, %p39_p9  ;;  %s689_s13 = sshll.u32 %s179_s11, 4 }
  0x27   : > { %s1093_s24 = scalar_lea.hbm %s1238_s0, %s714_s12  ;;  %s183_s25 = scalar_lea.vmem [#allocation2], %s689_s13 }
  0x28   : > { %s1252_s10 = scalar_select %p1084_p3, 1, 0 }
  0x29   : > { %s190_s26 = sshll.u32 %s183_s25, 4  ;;  %p1095_p11 = pnand %p775_p12, %p41_p13  ;;  %s1099_s26 = int_to_ptr.vmem [resolvable:$true] %s190_s26 }
  0x2a   : > { %s1101_s29 = scalar_lea.sflag [#allocation3], %s179_s11  ;;  %s843_s30 = scalar_lea.hbm %s1093_s24, 256 }
  0x2b   : > { %p844_p5 = scmp.ne.s32.totalorder %s1093_s24, %s843_s30  ;;  %p845_p7 = pneg %p1095_p11 }
  0x2c   : > { %s848_s12 = scalar_lea.hbm %s1238_s0, 512  ;;  %p849_p10 = scmp.lt.s32.totalorder %s1093_s24, %s1238_s0 }
  0x2d   : > { %p846_p2 = pnand %p845_p7, %p844_p5  ;;  %p850_p12 = scmp.lt.s32.totalorder %s848_s12, %s843_s30 }
  0x2f   : > { %p847_p9 = pneg %p846_p2  ;;  %p851_p13 = por %p850_p12, %p849_p10 }
  0x31   : > { %p852_p0 = pnand %p851_p13, %p847_p9 }
  0x33   : > { %855 = shalt.err (!%p852_p0)
}
  0x34   : > { %s856_s11 = scalar_lea.vmem %s1099_s26, 256  ;;  %s974_s20 = smov [#allocation2]  }
  0x35   : > { %p857_p1 = scmp.ne.s32.totalorder %s1099_s26, %s856_s11  ;;  %s861_s25 = sshll.u32 %s974_s20, 4  ;;  %s862_s25 = int_to_ptr.vmem [resolvable:$false] %s861_s25 }
  0x36   : > { %s863_s7 = scalar_lea.vmem %s862_s25, 512  ;;  %p864_p2 = scmp.lt.s32.totalorder %s1099_s26, %s862_s25 }
  0x37   : > { %p859_p6 = pnand %p857_p1, %p845_p7  ;;  %p865_p3 = scmp.lt.s32.totalorder %s863_s7, %s856_s11 }
  0x39   : > { %p860_p5 = pneg %p859_p6  ;;  %p866_p4 = por %p865_p3, %p864_p2 }
  0x3b   : > { %p867_p8 = pnand %p866_p4, %p860_p5 }
  0x3d   : > { %870 = shalt.err (!%p867_p8)
}
  0x3e   : > { %766 = dma.hbm_to_vmem [thread:$0]  (!%p1095_p11), %s1093_s24, 256, %s1099_s26, %s1101_s29, %s972_s5, %s972_s5, %s973_s6  }
  0x3f   : > { %p1254_p1 = scmp.ne.s32.totalorder %s1249_s23, 0 }
  0x40   : > { %s1128_s30 = sand.u32 (!%p1254_p1), 1, %s961_s16   ;;  %p1255_p4 = scmp.ne.s32.totalorder (!%p1254_p1), %s1247_s21, 0 }
  0x41   : > { %202 = sbr.rel (%p1254_p1) target bundleno = 438 (0x1b6), region = 32  ;;  %s693_s8 = sshll.u32 (!%p1254_p1), %s1128_s30, 4 }
  0x42   : > { %s205_s12 = scalar_lea.sflag (!%p1254_p1), [#allocation3], %s1128_s30  ;;  %s208_s28 = scalar_lea.vmem (!%p1254_p1), [#allocation2], %s693_s8 }
  0x46   : > { %940 = dma.done.wait (%p1255_p4), %s205_s12, 256  }
  0x47   : > { %942 = vsyncadd (%p1255_p4), %s205_s12, 4294967040  ;;  %p1256_p6 = scmp.eq.s32.totalorder %s1027_s19, 0 }
  0x49   : > { %944 = dma.done.wait (%p1256_p6), [#allocation6], 256   ;;  %p1257_p8 = pmov %p1256_p6 }
  0x4a   : > { %vm253_vm0 = vcmask 1043456   ;;  %vm246_vm1 = vcmask 97280   ;;  %v242_v0 = vld [vmem:[%s208_s28] sm:$0xff]  ;;  %v245_v1 = vld [vmem:[#allocation5 + $0x8] sm:$0xf]  ;;  %s975_s23 = smov 104  }
  0x4b   : > { %946 = vsyncadd (%p1257_p8), [#allocation6], 4294967040  ;;  %417 = vrot.lane.b32.xlu1 %v242_v0, %s975_s23  ;;  %s976_s5 = smov 116   ;;  %v244_v2 = vld [vmem:[#allocation5] sm:$0xff]  ;;  %v243_v3 = vld [vmem:[%s208_s28 + $0x8] sm:$0xff]  ;;  %728 = vmatprep.subr.msk.mxu0 %vm253_vm0, %v245_v1  ;;  %s715_s24 = sshll.u32 %s1027_s19, 8 }
  0x4c   : > { %332 = vrot.lane.b32.xlu0 %v242_v0, %s976_s5  ;;  %732 = vmatprep.mubr.msk.f32.mxu0 %vm246_vm1, %v242_v0  ;;  %v706_v13 = vld [vmem:[%s1240_s2] ss:$0 sm:$0xff]  ;;  %s234_s26 = scalar_lea.vmem [#allocation7], %s693_s8  ;;  %vm511_vm2 = vcmask 130048   ;;  %s1163_s11 = scalar_lea.hbm %s1241_s3, %s715_s24 }
  0x4d   : > { %729 = vmatpush3.msk.msra.mxu0 %vm253_vm0, %v245_v1  ;;  %735 = vmatprep.subr.msk.mxu1 %vm253_vm0, %v245_v1  ;;  %s557_s29 = sshll.u32 %s234_s26, 4  ;;  %s539_s20 = scalar_lea.sflag [#allocation4], %s1128_s30  ;;  %s1165_s29 = int_to_ptr.vmem [resolvable:$true] %s557_s29 }
  0x4e   : > { %730 = vmatprep.subr.mxu0 %v244_v2  ;;  %736 = vmatpush3.msk.msra.mxu1 %vm253_vm0, %v245_v1  ;;  %s871_s25 = scalar_lea.vmem %s1165_s29, 256  ;;  %p1258_p11 = scmp.ne.s32.totalorder %s1252_s10, 0 }
  0x4f   : > { %419 = vrot.lane.b32.xlu1 %v243_v3, %s975_s23  ;;  %731 = vmatpush3.msra.mxu0 %v244_v2  ;;  %p872_p3 = scmp.ne.s32.totalorder %s1165_s29, %s871_s25  ;;  %s977_s7 = smov [#allocation7]  }
  0x50   : > { %334 = vrot.lane.b32.xlu0 %v243_v3, %s976_s5  ;;  %737 = vmatprep.subr.mxu1 %v244_v2  ;;  %s875_s8 = sshll.u32 %s977_s7, 4  ;;  %s876_s8 = int_to_ptr.vmem [resolvable:$false] %s875_s8 }
  0x51   : > { %733 = vmatmul.mubr.msk.f32.vlgmr.msra.gmra.mxu0 %vm246_vm1, %v243_v3  ;;  %742 = vmatprep.subr.msk.mxu0 %vm253_vm0, %v245_v1  ;;  %p873_p7 = pnand %p872_p3, %p1258_p11  ;;  %s877_s12 = scalar_lea.vmem %s876_s8, 512 }
  0x52   : > { %743 = vmatpush3.msk.msra.mxu0 %vm253_vm0, %v245_v1  ;;  %738 = vmatpush3.msra.mxu1 %v244_v2  ;;  %p878_p10 = scmp.lt.s32.totalorder %s1165_s29, %s876_s8  ;;  %p879_p12 = scmp.lt.s32.totalorder %s877_s12, %s871_s25 }
  0x53   : > { %744 = vmatprep.subr.mxu0 %v244_v2  ;;  %p874_p9 = pneg %p873_p7 }
  0x54   : > { %745 = vmatpush3.msra.mxu0 %v244_v2  ;;  %p880_p13 = por %p879_p12, %p878_p10 }
  0x56   : > { %p881_p0 = pnand %p880_p13, %p874_p9 }
  0xbd   : > { %v418_v4 = vpop.permute.xlu1 %417 }
  0xbe   : > { %v333_v5 = vpop.permute.xlu0 %332  ;;  %746 = vmatprep.mubr.msk.f32.mxu0 %vm246_vm1, %v418_v4 }
  0xbf   : > { %739 = vmatprep.mubr.msk.f32.mxu1 %vm246_vm1, %v333_v5 }
  0xc1   : > { %v420_v6 = vpop.permute.xlu1 %419 }
  0xc2   : > { %v335_v7 = vpop.permute.xlu0 %334  ;;  %747 = vmatmul.mubr.msk.f32.vlgmr.msra.gmra.mxu0 %vm246_vm1, %v420_v6 }
  0xc3   : > { %740 = vmatmul.mubr.msk.f32.vlgmr.msra.gmra.mxu1 %vm246_vm1, %v335_v7 }
 0x111   : > { %v734_v8 = vpop.f32.mrf.mxu0 }
 0x113   : > { %v323_v9 = vpop.f32.mrf.mxu0 }
 0x182   : > { %v748_v11 = vpop.f32.mrf.mxu0 }
 0x183   : > { %v741_v10 = vpop.f32.mrf.mxu1 }
 0x184   : > { %v416_v12 = vmax.f32 %v734_v8, %v741_v10  ;;  %v491_v17 = vpop.f32.mrf.mxu0 }
 0x185   : > { %v406_v14 = vpop.f32.mrf.mxu1 }
 0x186   : > { %v501_v15 = vmax.f32 %v416_v12, %v748_v11  ;;  %v415_v16 = vmax.f32 %v323_v9, %v406_v14 }
 0x188   : > { %v510_v18 = vadd.f32 %v706_v13, %v501_v15  ;;  %v500_v19 = vmax.f32 %v415_v16, %v491_v17 }
 0x18a   : > { %513 = vst.msk [vmem:[%s234_s26 + $0x8] sm:$0xff] %vm511_vm2, %v510_v18  ;;  %v524_v20 = vmul.f32 %v510_v18, %v510_v18  ;;  %v509_v21 = vadd.f32 %v706_v13, %v500_v19  ;;  %v515_v22 = vsel %vm511_vm2, %v510_v18, 0.0 }
 0x18c   : > { %512 = vst.msk [vmem:[%s234_s26] sm:$0xff] %vm511_vm2, %v509_v21  ;;  %v514_v23 = vsel %vm511_vm2, %v509_v21, 0.0  ;;  %v523_v24 = vmul.f32 %v509_v21, %v509_v21 }
 0x18d   : > { %v516_v25 = vadd.f32 %v515_v22, %v514_v23 }
 0x18e   : > { %884 = shalt.err (!%p881_p0)
}
 0x18f   : > { %s885_s28 = scalar_lea.hbm %s1163_s11, 256  ;;  %s889_s21 = scalar_lea.hbm %s1241_s3, 512 }
 0x190   : > { %p886_p5 = scmp.ne.s32.totalorder %s1163_s11, %s885_s28  ;;  %p890_p4 = scmp.lt.s32.totalorder %s1163_s11, %s1241_s3 }
 0x191   : > { %p891_p6 = scmp.lt.s32.totalorder %s889_s21, %s885_s28 }
 0x192   : > { %p887_p2 = pnand %p886_p5, %p1258_p11 }
 0x193   : > { %p892_p8 = por %p891_p6, %p890_p4 }
 0x194   : > { %p888_p1 = pneg %p887_p2 }
 0x196   : > { %p893_p3 = pnand %p892_p8, %p888_p1 }
 0x198   : > { %896 = shalt.err (!%p893_p3)
}
 0x199   : > { %s978_s26 = smov 128   ;;  %s979_s13 = smov 8   ;;  %v526_v26 = vsel %vm511_vm2, %v524_v20, 0.0  ;;  %v525_v27 = vsel %vm511_vm2, %v523_v24, 0.0  ;;  %v517_v28 = vrot.slane %v516_v25, 4  ;;  %vm534_vm3 = vcmask 1040384  }
 0x19a   : > { %755 = dma.vmem_to_hbm [thread:$0]  (%p1258_p11), %s1165_s29, 256, %s1163_s11, %s539_s20, %s978_s26, %s978_s26, %s979_s13   ;;  %v527_v29 = vadd.f32 %v526_v26, %v525_v27  ;;  %vm536_vm4 = vcmask 123904  }
 0x19b   : > { %v518_v30 = vadd.f32 %v517_v28, %v516_v25  ;;  %s696_s14 = sshll.u32 %s1128_s30, 1  ;;  %s711_s25 = sshll.u32 %s1027_s19, 5 }
 0x19c   : > { %v528_v31 = vrot.slane %v527_v29, 4  ;;  %s241_s29 = scalar_lea.vmem [#allocation8], %s696_s14  ;;  %s1201_s8 = scalar_lea.hbm %s1242_s4, %s711_s25 }
 0x19d   : > { %v519_v32 = vrot.slane %v518_v30, 2  ;;  %s573_s11 = sshll.u32 %s241_s29, 4  ;;  %s544_s12 = scalar_lea.sflag [#allocation9], %s1128_s30  ;;  %s574_s11 = int_to_ptr.vmem [resolvable:$true] %s573_s11 }
 0x19e   : > { %v529_v33 = vadd.f32 %v528_v31, %v527_v29  ;;  %s897_s28 = scalar_lea.vmem %s574_s11, 32  ;;  %s980_s19 = smov [#allocation8]  }
 0x19f   : > { %v520_v34 = vadd.f32 %v519_v32, %v518_v30  ;;  %p898_p7 = scmp.ne.s32.totalorder %s574_s11, %s897_s28  ;;  %s901_s23 = sshll.u32 %s980_s19, 4  ;;  %s902_s23 = int_to_ptr.vmem [resolvable:$false] %s901_s23 }
 0x1a0   : > { %v530_v35 = vrot.slane %v529_v33, 2  ;;  %s903_s5 = scalar_lea.vmem %s902_s23, 64  ;;  %p904_p12 = scmp.lt.s32.totalorder %s574_s11, %s902_s23 }
 0x1a1   : > { %v521_v36 = vrot.slane %v520_v34, 1  ;;  %p899_p9 = pnand %p898_p7, %p1258_p11  ;;  %p905_p13 = scmp.lt.s32.totalorder %s903_s5, %s897_s28 }
 0x1a2   : > { %v531_v37 = vadd.f32 %v530_v35, %v529_v33 }
 0x1a3   : > { %v522_v39 = vadd.f32 %v521_v36, %v520_v34  ;;  %p900_p10 = pneg %p899_p9  ;;  %p906_p0 = por %p905_p13, %p904_p12 }
 0x1a4   : > { %v532_v38 = vrot.slane %v531_v37, 1 }
 0x1a5   : > { %p907_p5 = pnand %p906_p0, %p900_p10 }
 0x1a6   : > { %v533_v40 = vadd.f32 %v532_v38, %v531_v37 }
 0x1a8   : > { %v535_v41 = vsel %vm534_vm3, %v522_v39, %v533_v40 }
 0x1a9   : > { %537 = vst.msk [vmem:[%s241_s29] sm:$0x3] %vm536_vm4, %v535_v41 }
 0x1aa   : > { %910 = shalt.err (!%p907_p5)
}
 0x1ab   : > { %s911_s21 = scalar_lea.hbm %s1201_s8, 32  ;;  %s915_s24 = scalar_lea.hbm %s1242_s4, 64 }
 0x1ac   : > { %p912_p2 = scmp.ne.s32.totalorder %s1201_s8, %s911_s21  ;;  %p916_p6 = scmp.lt.s32.totalorder %s1201_s8, %s1242_s4 }
 0x1ad   : > { %p917_p8 = scmp.lt.s32.totalorder %s915_s24, %s911_s21 }
 0x1ae   : > { %p913_p1 = pnand %p912_p2, %p1258_p11 }
 0x1af   : > { %p918_p3 = por %p917_p8, %p916_p6 }
 0x1b0   : > { %p914_p4 = pneg %p913_p1 }
 0x1b2   : > { %p919_p7 = pnand %p918_p3, %p914_p4 }
 0x1b4   : > { %922 = shalt.err (!%p919_p7)
}
 0x1b5   : > { %756 = dma.vmem_to_hbm [thread:$0]  (%p1258_p11), %s574_s11, 32, %s1201_s8, %s544_s12  }
 0x1b6 PF: > { %s585_s14 = sand.u32 1, %s957_s15   ;;  %p1259_p9 = scmp.ne.s32.totalorder %s1248_s22, 0 }
 0x1b7   : > { %p1260_p10 = scmp.ge.s32.totalorder %s969_s18, 2  ;;  %s586_s25 = scalar_lea.sflag [#allocation4], %s585_s14 }
 0x1b9   : > { %p768_p12 = pnand %p1260_p10, %p1259_p9 }
 0x1bb   : > { %p769_p13 = pneg %p768_p12 }
 0x1bd   : > { %948 = dma.done.wait (%p769_p13), %s586_s25, 256  }
 0x1be   : > { %950 = vsyncadd (%p769_p13), %s586_s25, 4294967040  ;;  %s595_s29 = scalar_lea.sflag [#allocation9], %s585_s14 }
 0x1bf   : > { %952 = dma.done.wait (%p769_p13), %s595_s29, 32  }
 0x1c0   : > { %954 = vsyncadd (%p769_p13), %s595_s29, 4294967264  ;;  %p22_p11 = scmp.ge.s32.totalorder %s1060_s27, 4   ;;  %s1261_s15 = smov %s961_s16 }
 0x1c1   : > { %s1262_s16 = smov %s965_s17  ;;  %s1263_s17 = smov %s1080_s9 }
 0x1c2   : > { %s1264_s18 = smov %s1060_s27  ;;  %24 = sbr.rel (!%p22_p11) target bundleno = 8 (0x8), region = 98 }
 0x1c7   :  { %600 = vsyncpa [#allocation3], 1 }
 0x1c8   :  { %602 = vsyncpa [#allocation3 + $0x1], 1 }
 0x1c9   :  { %603 = vsyncpa [#allocation6], 1 }
 0x1ca   :  { %604 = vsyncpa [#allocation4], 1 }
 0x1cb   :  { %606 = vsyncpa [#allocation4 + $0x1], 1 }
 0x1cc   :  { %607 = vsyncpa [#allocation9], 1 }
 0x1cd   :  { %609 = vsyncpa [#allocation9 + $0x1], 1 }

</bundles_post_ra>
